<compile_context>
chip_gen: v7x
topology: tpu7x:2x2x1
jax: 0.10.0
libtpu: 0.0.40
codegen_flags: <defaults>
</compile_context>

<pallas_src>
import jax
import jax.numpy as jnp
from jax.experimental import pallas as pl
from jax.experimental.pallas import tpu as pltpu


def _copy_kernel(x_ref, o_ref):
    # The shuffle is expressed in the BlockSpec index_maps; the body is a plain
    # full-tile VMEM copy.
    o_ref[...] = x_ref[...]


def _ceil_to(x, m):
    return -(-x // m) * m


def _pick_batch_tile(b, padded_bytes_per_b, payload_bytes_per_b):
    """Largest divisor of b whose padded, double-buffered in+out VMEM footprint
    stays under a conservative budget; stop early once a step carries ~1 MiB."""
    TARGET_PAYLOAD = 1 << 20      # >= ~1 MiB per grid step amortizes step cost
    VMEM_BUDGET = 12 << 20        # in+out, double-buffered, padded
    best = 1
    for bt in range(1, b + 1):
        if b % bt:
            continue
        if 4 * bt * padded_bytes_per_b > VMEM_BUDGET:   # 2 arrays x 2 buffers
            break
        best = bt
        if bt * payload_bytes_per_b >= TARGET_PAYLOAD:
            break
    return best


def channel_shuffle(x, group_num):
    b, c, h, w = x.shape
    g = int(group_num)
    assert c % g == 0, "channels must be divisible by group_num"
    cpg = c // g
    hw = h * w
    itemsize = jnp.dtype(x.dtype).itemsize

    cost = pl.CostEstimate(
        flops=0,
        transcendentals=0,
        bytes_accessed=2 * b * c * hw * itemsize,
    )
    payload_per_b = cpg * hw * itemsize

    # PyTorch semantics: out[:, j*g + i] = x[:, i*cpg + j]  (i in [0,g), j in [0,cpg))

    if hw % 128 == 0:
        # ---- lane-dense path -------------------------------------------------
        # in : view (b, g, cpg, hw), block (bt, 1, cpg, hw) -> contiguous group read
        # out: shape (b, cpg, g*hw), block (bt, cpg, hw)    -> 128-aligned lane block
        padded_per_b = _ceil_to(cpg, 8) * hw * itemsize
        bt = _pick_batch_tile(b, padded_per_b, payload_per_b)

        x_view = x.reshape(b, g, cpg, hw)
        out_flat = pl.pallas_call(
            _copy_kernel,
            out_shape=jax.ShapeDtypeStruct((b, cpg, g * hw), x.dtype),
            grid_spec=pltpu.PrefetchScalarGridSpec(
                num_scalar_prefetch=0,
                grid=(b // bt, g),
                in_specs=[pl.BlockSpec((bt, None, cpg, hw),
                                       lambda bi, gi: (bi, gi, 0, 0))],
                out_specs=pl.BlockSpec((bt, cpg, hw),
                                       lambda bi, gi: (bi, 0, gi)),
            ),
            compiler_params=pltpu.CompilerParams(
                dimension_semantics=("parallel", "parallel"),
            ),
            cost_estimate=cost,
        )(x_view)
        # out_flat[b, j, i*hw + s] == x[b, i*cpg + j, s]  ->  channel j*g + i
        return out_flat.reshape(b, c, h, w)

    # ---- general path (hw not a multiple of 128) ------------------------------
    # Keep (h, w) as the last two (full) block dims so the g-strided output axis
    # stays out of the sublane/lane dims; tiling rule holds for any h, w.
    padded_per_b = cpg * _ceil_to(h, 8) * _ceil_to(w, 128) * itemsize
    bt = _pick_batch_tile(b, padded_per_b, payload_per_b)

    x_view = x.reshape(b, g, cpg, h, w)
    out5 = pl.pallas_call(
        _copy_kernel,
        out_shape=jax.ShapeDtypeStruct((b, cpg, g, h, w), x.dtype),
        grid_spec=pltpu.PrefetchScalarGridSpec(
            num_scalar_prefetch=0,
            grid=(b // bt, g),
            in_specs=[pl.BlockSpec((bt, None, cpg, h, w),
                                   lambda bi, gi: (bi, gi, 0, 0, 0))],
            out_specs=pl.BlockSpec((bt, cpg, None, h, w),
                                   lambda bi, gi: (bi, 0, gi, 0, 0)),
        ),
        compiler_params=pltpu.CompilerParams(
            dimension_semantics=("parallel", "parallel"),
        ),
        cost_estimate=cost,
    )(x_view)
    # out5[b, j, i, :, :] == x[b, i*cpg + j, :, :]  ->  channel j*g + i
    return out5.reshape(b, c, h, w)


def channel_shuffle_ref(x, group_num):
    b, c, h, w = x.shape
    g = group_num
    y = x.reshape(b, g, c // g, h, w)
    y = jnp.transpose(y, (0, 2, 1, 3, 4))
    return y.reshape(b, c, h, w)


if __name__ == "__main__":
    k1, k2 = jax.random.split(jax.random.PRNGKey(0))

    # Primary case (lane-dense path): b=2, c=4, 16x16 maps, group_num=2.
    group_num = 2
    b, c, h, w = 2, 4, 16, 16
    x = jax.random.normal(k1, (b, c, h, w), dtype=jnp.float32)

    out = jax.block_until_ready(channel_shuffle(x, group_num))
    ref = channel_shuffle_ref(x, group_num)
    assert out.shape == (b, c, h, w) and out.dtype == x.dtype
    assert jnp.array_equal(out, ref), "Pallas channel shuffle mismatch (fast path)"

    # Secondary case (general path, hw % 128 != 0): 7x7 maps, group_num=3.
    b2, c2, h2, w2, g2 = 2, 6, 7, 7, 3
    x2 = jax.random.normal(k2, (b2, c2, h2, w2), dtype=jnp.float32)
    out2 = jax.block_until_ready(channel_shuffle(x2, g2))
    ref2 = channel_shuffle_ref(x2, g2)
    assert jnp.array_equal(out2, ref2), "Pallas channel shuffle mismatch (general path)"

    print("KERNEL_OK")
</pallas_src>

<mosaic_0001>
module attributes {stable_mosaic.version = 11 : i64} {
  func.func @_copy_kernel(%arg0: i32, %arg1: i32, %arg2: memref<2x1x2x256xf32, #tpu.memory_space<vmem>>, %arg3: memref<2x2x256xf32, #tpu.memory_space<vmem>>) attributes {dimension_semantics = [#tpu.dimension_semantics<parallel>, #tpu.dimension_semantics<parallel>], iteration_bounds = array<i64: 1, 2>, scalar_prefetch = 0 : i64, scratch_operands = 0 : i64, tpu.core_type = #tpu.core_type<tc>, window_params = [{transform_indices = @transform_0, window_bounds = array<i64: 2, 1, 2, 256>}, {transform_indices = @transform_1, window_bounds = array<i64: 2, 2, 256>}]} {
    %c0 = arith.constant 0 : index
    %c0_0 = arith.constant 0 : index
    %c0_1 = arith.constant 0 : index
    %c0_2 = arith.constant 0 : index
    %0 = vector.load %arg2[%c0, %c0_0, %c0_1, %c0_2] : memref<2x1x2x256xf32, #tpu.memory_space<vmem>>, vector<2x1x2x256xf32>
    %1 = vector.shape_cast %0 : vector<2x1x2x256xf32> to vector<2x2x256xf32>
    %c0_3 = arith.constant 0 : index
    %c0_4 = arith.constant 0 : index
    %c0_5 = arith.constant 0 : index
    %2 = vector.load %arg3[%c0_3, %c0_4, %c0_5] : memref<2x2x256xf32, #tpu.memory_space<vmem>>, vector<2x2x256xf32>
    tpu.vector_store %arg3[%c0_3, %c0_4, %c0_5], %1 {strides = array<i32>} : memref<2x2x256xf32, #tpu.memory_space<vmem>>, vector<2x2x256xf32>,
    return
  }
  func.func @transform_0(%arg0: i32, %arg1: i32) -> (i32, i32, i32, i32) {
    %c0_i32 = arith.constant 0 : i32
    %c0_i32_0 = arith.constant 0 : i32
    %c0_i32_1 = arith.constant 0 : i32
    return %arg0, %arg1, %c0_i32, %c0_i32_0 : i32, i32, i32, i32
  }
  func.func @transform_1(%arg0: i32, %arg1: i32) -> (i32, i32, i32) {
    %c0_i32 = arith.constant 0 : i32
    %c0_i32_0 = arith.constant 0 : i32
    return %arg0, %c0_i32, %arg1 : i32, i32, i32
  }
}

</mosaic_0001>

<bundles_post_ra>
// kernel: tpu_custom_call.1
= control target key start
LH: loop header
LB: loop body
LE: loop exit
PB: predicated region body
PF: predicated region fallthrough
CT: control target
= control target key end

     0   :  { %6 = vsyncpa [#allocation3], 0  ;;  %s655_s0 = inlined_call_operand.hbm [shape: f32[2,2,2,256], index: 0, kind: input, shape index: {}]   ;;  %s656_s1 = inlined_call_operand.hbm [shape: f32[2,2,512], index: 1, kind: output, shape index: {}]  }
   0x1   :  { %8 = vsyncpa [#allocation3 + $0x1], 0 }
   0x2   :  { %9 = vsyncpa [#allocation4], 0 }
   0x3   :  { %11 = vsyncpa [#allocation4 + $0x1], 0  ;;  %s482_s6 = smov 0   ;;  %s484_s7 = smov 0  }
   0x4   :  { %s486_s8 = smov 0   ;;  %s488_s9 = smov 0  }
   0x5   :  { %s490_s10 = smov 0   ;;  %s492_s11 = smov 0  }
   0x6 LB: > { %s265_s12 = sadd.s32 4294967295, %s462_s11   ;;  %s266_s13 = sadd.s32 4294967294, %s462_s11   ;;  %s462_s11 = sphi %s492_s11, %s17_s11   ;;  %s458_s10 = sphi %s490_s10, %s670_s10   ;;  %s454_s9 = sphi %s488_s9, %s669_s9   ;;  %s450_s8 = sphi %s486_s8, %s668_s8   ;;  %s446_s7 = sphi %s484_s7, %s667_s7   ;;  %s442_s6 = sphi %s482_s6, %s666_s6  }
   0x7   : > { %s26_s14 = sadd.s32 1, %s458_s10  ;;  %s38_s15 = sadd.s32 1, %s450_s8 }
   0x8   : > { %p27_p0 = scmp.ge.s32.totalorder %s26_s14, 2  ;;  %p45_p1 = scmp.ne.s32.totalorder %s450_s8, %s446_s7 }
   0x9   : > { %p46_p2 = scmp.eq.s32.totalorder %s462_s11, 0  ;;  %p51_p3 = scmp.ne.s32.totalorder %s446_s7, %s442_s6 }
   0xa   : > { %s672_s14 = smov (%p27_p0, %s26_s14), 0  ;;  %p52_p5 = scmp.eq.s32.totalorder %s265_s12, 0 }
   0xb   : > { %p523_p4 = por %p46_p2, %p45_p1  ;;  %s34_s17 = ssub.s32 %s458_s10, %s672_s14 }
   0xc   : > { %p77_p6 = scmp.eq.s32.totalorder %s265_s12, 1  ;;  %p36_p7 = scmp.eq.s32.totalorder %s34_s17, 0 }
   0xd   : > { %p529_p8 = por %p52_p5, %p51_p3  ;;  %p83_p10 = scmp.eq.s32.totalorder %s266_s13, 1 }
   0xe   : > { %p533_p9 = por %p77_p6, %p45_p1  ;;  %p294_p13 = scmp.lt.s32.totalorder %s462_s11, 2 }
   0xf   : > { %s538_s20 = scalar_select %p36_p7, %s450_s8, %s38_s15  }
  0x10   : > { %s660_s19 = scalar_select %p533_p9, 1, 0 }
  0x11   : > { %p540_p11 = por %p83_p10, %p51_p3  ;;  %s103_s22 = sand.u32 1, %s450_s8  }
  0x12   : > { %s269_s23 = sshll.u32 %s103_s22, 3  ;;  %s280_s24 = sshll.u32 %s458_s10, 6 }
  0x13   : > { %s661_s21 = scalar_select %p540_p11, 1, 0 }
  0x14   : > { %s551_s27 = scalar_lea.hbm %s655_s0, %s280_s24  ;;  %s107_s28 = scalar_lea.vmem [#allocation2], %s269_s23 }
  0x15   : > { %s117_s29 = sshll.u32 %s107_s28, 4  ;;  %p557_p0 = pnand %p294_p13, %p523_p4  ;;  %s553_s29 = int_to_ptr.vmem [resolvable:$true] %s117_s29 }
  0x16   : > { %s561_s2 = scalar_lea.sflag [#allocation3], %s103_s22  ;;  %s350_s3 = scalar_lea.hbm %s551_s27, 128 }
  0x17   : > { %p351_p1 = scmp.ne.s32.totalorder %s551_s27, %s350_s3  ;;  %p352_p2 = pneg %p557_p0 }
  0x18   : > { %s355_s12 = scalar_lea.hbm %s655_s0, 256  ;;  %p356_p4 = scmp.lt.u32.totalorder %s551_s27, %s655_s0 }
  0x19   : > { %p353_p3 = pnand %p352_p2, %p351_p1  ;;  %p357_p6 = scmp.lt.u32.totalorder %s355_s12, %s350_s3 }
  0x1a   : > { %p359_p10 = scmp.lt.u32.totalorder %s350_s3, %s551_s27 }
  0x1b   : > { %p354_p5 = pneg %p353_p3  ;;  %p358_p7 = por %p357_p6, %p356_p4 }
  0x1d   : > { %p360_p13 = por %p359_p10, %p358_p7 }
  0x1f   : > { %p361_p12 = pnand %p360_p13, %p354_p5 }
  0x21   : > { %364 = shalt.err (!%p361_p12)
}
  0x22   : > { %s365_s16 = scalar_lea.vmem %s553_s29, 128  ;;  %s464_s17 = smov [#allocation2]  }
  0x23   : > { %p366_p1 = scmp.ne.s32.totalorder %s553_s29, %s365_s16  ;;  %s370_s22 = sshll.u32 %s464_s17, 4  ;;  %s371_s22 = int_to_ptr.vmem [resolvable:$false] %s370_s22 }
  0x24   : > { %s372_s23 = scalar_lea.vmem %s371_s22, 256  ;;  %p373_p9 = scmp.lt.s32.totalorder %s553_s29, %s371_s22 }
  0x25   : > { %p368_p3 = pnand %p366_p1, %p352_p2  ;;  %p374_p4 = scmp.lt.s32.totalorder %s372_s23, %s365_s16 }
  0x27   : > { %p369_p11 = pneg %p368_p3  ;;  %p375_p6 = por %p374_p4, %p373_p9 }
  0x29   : > { %p376_p7 = pnand %p375_p6, %p369_p11 }
  0x2b   : > { %379 = shalt.err (!%p376_p7)
}
  0x2c   : > { %s465_s24 = smov 128   ;;  %s466_s25 = smov 64  }
  0x2d   : > { %s467_s26 = smov 4   ;;  %p272_p12 = scmp.ge.s32.totalorder %s462_s11, 1 }
  0x2e   : > { %289 = dma.hbm_to_vmem [thread:$0]  (!%p557_p0), %s551_s27, 128, %s553_s29, %s561_s2, %s465_s24, %s466_s25, %s467_s26  }
  0x2f   : > { %p125_p2 = scmp.lt.s32.totalorder %s462_s11, 3 }
  0x31   : > { %p126_p5 = pnand %p272_p12, %p125_p2 }
  0x32   : > { %s592_s28 = sand.u32 (!%p126_p5), 1, %s446_s7  }
  0x33   : > { %129 = sbr.rel (%p126_p5) target bundleno = 87 (0x57), region = 24  ;;  %s273_s3 = sshll.u32 (!%p126_p5), %s592_s28, 3 }
  0x34   : > { %s132_s4 = scalar_lea.sflag (!%p126_p5), [#allocation3], %s592_s28  ;;  %s135_s5 = scalar_lea.vmem (!%p126_p5), [#allocation2], %s273_s3 }
  0x3a   : > { %433 = dma.done.wait (%p529_p8), %s132_s4, 128  }
  0x3b   : > { %435 = vsyncadd (%p529_p8), %s132_s4, 4294967168  ;;  %s153_s27 = scalar_lea.vmem [#allocation5], %s273_s3  ;;  %s281_s30 = sshll.u32 %s454_s9, 6  ;;  %v157_v0 = vld [vmem:[%s135_s5] sm:$0xff]  }
  0x3c   : > { %s178_s29 = sshll.u32 %s153_s27, 4  ;;  %s606_s13 = scalar_lea.hbm %s656_s1, %s281_s30  ;;  %159 = vst [vmem:[%s153_s27] sm:$0xff] %v157_v0   ;;  %s601_s29 = int_to_ptr.vmem [resolvable:$true] %s178_s29 }
  0x3d   : > { %s162_s18 = scalar_lea.sflag [#allocation4], %s592_s28  ;;  %s380_s15 = scalar_lea.vmem %s601_s29, 128 }
  0x3e   : > { %p381_p8 = scmp.ne.s32.totalorder %s601_s29, %s380_s15  ;;  %p663_p9 = scmp.ne.s32.totalorder %s660_s19, 0 }
  0x3f   : > { %s468_s16 = smov [#allocation5]  }
  0x40   : > { %p382_p11 = pnand %p381_p8, %p663_p9  ;;  %s384_s9 = sshll.u32 %s468_s16, 4  ;;  %s385_s9 = int_to_ptr.vmem [resolvable:$false] %s384_s9 }
  0x41   : > { %s386_s17 = scalar_lea.vmem %s385_s9, 256  ;;  %p387_p10 = scmp.lt.s32.totalorder %s601_s29, %s385_s9 }
  0x42   : > { %p383_p0 = pneg %p382_p11  ;;  %p388_p13 = scmp.lt.s32.totalorder %s386_s17, %s380_s15 }
  0x44   : > { %p389_p1 = por %p388_p13, %p387_p10 }
  0x46   : > { %p390_p3 = pnand %p389_p1, %p383_p0 }
  0x48   : > { %393 = shalt.err (!%p390_p3)
}
  0x49   : > { %s394_s22 = scalar_lea.hbm %s606_s13, 128  ;;  %s398_s25 = scalar_lea.hbm %s656_s1, 256 }
  0x4a   : > { %p395_p4 = scmp.ne.s32.totalorder %s606_s13, %s394_s22  ;;  %p399_p12 = scmp.lt.u32.totalorder %s606_s13, %s656_s1 }
  0x4b   : > { %p400_p2 = scmp.lt.u32.totalorder %s398_s25, %s394_s22  ;;  %p402_p8 = scmp.lt.u32.totalorder %s394_s22, %s606_s13 }
  0x4c   : > { %p396_p6 = pnand %p395_p4, %p663_p9 }
  0x4d   : > { %p401_p5 = por %p400_p2, %p399_p12 }
  0x4e   : > { %p397_p7 = pneg %p396_p6 }
  0x4f   : > { %p403_p11 = por %p402_p8, %p401_p5 }
  0x51   : > { %p404_p0 = pnand %p403_p11, %p397_p7 }
  0x53   : > { %407 = shalt.err (!%p404_p0)
}
  0x54   : > { %s469_s4 = smov 64   ;;  %s470_s5 = smov 128  }
  0x55   : > { %s471_s27 = smov 4  }
  0x56   : > { %284 = dma.vmem_to_hbm [thread:$0]  (%p663_p9), %s601_s29, 128, %s606_s13, %s162_s18, %s469_s4, %s470_s5, %s471_s27  }
  0x57 PF: > { %s193_s30 = sand.u32 1, %s442_s6   ;;  %p664_p10 = scmp.ne.s32.totalorder %s661_s21, 0 }
  0x58   : > { %p665_p13 = scmp.ge.s32.totalorder %s462_s11, 2  ;;  %s194_s2 = scalar_lea.sflag [#allocation4], %s193_s30 }
  0x5a   : > { %p291_p1 = pnand %p665_p13, %p664_p10 }
  0x5c   : > { %437 = dma.done.wait (!%p291_p1), %s194_s2, 128  }
  0x5d   : > { %439 = vsyncadd (!%p291_p1), %s194_s2, 4294967168  ;;  %s17_s11 = sadd.s32 1, %s462_s11   ;;  %s666_s6 = smov %s446_s7 }
  0x5e   : > { %p14_p3 = scmp.ge.s32.totalorder %s17_s11, 4   ;;  %s667_s7 = smov %s450_s8 }
  0x5f   : > { %s668_s8 = smov %s538_s20  ;;  %s669_s9 = smov %s458_s10 }
  0x60   : > { %s670_s10 = smov %s672_s14  ;;  %16 = sbr.rel (!%p14_p3) target bundleno = 6 (0x6), region = 69 }
  0x67   :  { %199 = vsyncpa [#allocation3], 1 }
  0x68   :  { %201 = vsyncpa [#allocation3 + $0x1], 1 }
  0x69   :  { %202 = vsyncpa [#allocation4], 1 }
  0x6a   :  { %204 = vsyncpa [#allocation4 + $0x1], 1 }

</bundles_post_ra>
